<compile_context>
chip_gen: v5e
topology: v5e:2x2
jax: 0.10.0
libtpu: 0.0.40
codegen_flags: <defaults>
</compile_context>

<pallas_src>
import functools

import jax
import jax.numpy as jnp
from jax import lax
from jax.experimental import pallas as pl
from jax.experimental.pallas import tpu as pltpu


# ------------------------------- Pallas kernel ------------------------------- #
def _deconv_gn_relu_kernel(p_ref, w_ref, gamma_ref, beta_ref, o_ref, *,
                           num_groups, eps):
    """One batch element (all groups, all sub-pixel phases).

    p_ref:     (Kc, P)       bf16  shared sub-pixel im2col patches (all phases)
    w_ref:     (Co*s*s, Kc)  bf16  per-phase flattened weights, rows = (co, py, px)
    gamma_ref: (Co*s*s, 1)   f32   gamma[co] repeated s*s times (row aligned)
    beta_ref:  (Co*s*s, 1)   f32
    o_ref:     (Co*s*s, P)   f32   phase-major output (pixel-shuffled in wrapper)
    """
    # Single MXU GEMM for every group and phase, f32 accumulation.
    y = jnp.dot(w_ref[...], p_ref[...], preferred_element_type=jnp.float32)  # (R, P)
    R, P = y.shape
    Rg = R // num_groups                      # rows per group = Cg * s * s
    inv_n = 1.0 / float(Rg * P)

    # Static per-group loop (num_groups small & static) -> only 2-D ops / static slices.
    for g in range(num_groups):
        lo, hi = g * Rg, (g + 1) * Rg
        seg = y[lo:hi, :]                                     # (Rg, P)
        # One-pass GroupNorm statistics in f32.
        s1 = jnp.sum(seg, keepdims=True)                      # (1, 1)
        s2 = jnp.sum(seg * seg, keepdims=True)                # (1, 1)
        mean = s1 * inv_n
        var = jnp.maximum(s2 * inv_n - mean * mean, 0.0)      # biased var (PyTorch GN)
        rstd = lax.rsqrt(var + eps)                           # EUP
        # Reassociated affine: one FMA pass over the (Rg, P) block.
        scale = gamma_ref[lo:hi, :] * rstd                    # (Rg, 1)
        shift = beta_ref[lo:hi, :] - mean * scale             # (Rg, 1)
        o_ref[lo:hi, :] = jnp.maximum(seg * scale + shift, 0.0).astype(o_ref.dtype)


# --------------------------------- wrapper ----------------------------------- #
def conv_transpose_gn_relu(x_nchw, weight_t, gamma, beta, *, stride, pad,
                           output_pad, num_groups, eps=1e-5):
    """ConvTranspose2d(bias=False) -> GroupNorm(num_groups) -> ReLU (NCHW f32)."""
    N, Ci, H, W = x_nchw.shape
    Ci_w, Co, K, K2 = weight_t.shape
    assert Ci == Ci_w and K == K2
    assert Co % num_groups == 0
    s = stride
    G = num_groups

    Ho = (H - 1) * s - 2 * pad + K + output_pad
    Wo = (W - 1) * s - 2 * pad + K + output_pad
    assert Ho % s == 0 and Wo % s == 0, "sub-pixel decomposition needs s | Ho, Wo"
    Qy, Qx = Ho // s, Wo // s
    Qp = Qy * Qx

    # --- sub-pixel (phase) decomposition of the transposed conv ----------------
    # out[oy,ox] with oy = s*qy + py uses input rows iy = qy + ry where
    # ky = py + pad - s*ry must lie in [0, K).  The union of ry over all phases is
    # [ry_lo, ry_hi]; a single Rk x Rk stride-1 im2col over the (slightly padded)
    # un-dilated input therefore serves every phase; per-phase weights carry zeros
    # for window positions the phase does not use.
    ry_lo = -((K - 1 - pad) // s)            # ceil((pad - K + 1)/s)
    ry_hi = (s - 1 + pad) // s               # floor((s - 1 + pad)/s)
    Rk = ry_hi - ry_lo + 1                   # = ceil(K/s) for the usual configs

    pad_top = max(0, -ry_lo)
    base = ry_lo + pad_top
    pad_bot_y = max(0, base + Rk - 1 + Qy - pad_top - H)
    pad_bot_x = max(0, base + Rk - 1 + Qx - pad_top - W)
    zero = jnp.array(0, dtype=x_nchw.dtype)
    xp = lax.pad(x_nchw, zero,
                 ((0, 0, 0), (0, 0, 0),
                  (pad_top, pad_bot_y, 0), (pad_top, pad_bot_x, 0)))

    # Shared lane-dense im2col over the *un-dilated* input: (N, Rk*Rk*Ci, Qp),
    # tap-major / channel-minor ordering.  Only ~2x the raw input bytes (bf16).
    cols = []
    for ty in range(Rk):
        for tx in range(Rk):
            cols.append(xp[:, :, base + ty:base + ty + Qy,
                           base + tx:base + tx + Qx].reshape(N, Ci, Qp))
    Kraw = Rk * Rk * Ci
    patches = jnp.concatenate(cols, axis=1).astype(jnp.bfloat16)       # (N, Kraw, Qp)

    # Contraction dim padded to a multiple of the bf16 sublane tile (16).
    Kc = ((Kraw + 15) // 16) * 16
    if Kc != Kraw:
        patches = jnp.pad(patches, ((0, 0), (0, Kc - Kraw), (0, 0)))

    # Per-phase flattened weights: rows = (co, py, px), cols = (ty, tx, ci).
    s2n = s * s
    R = Co * s2n
    wt_f = weight_t.astype(jnp.float32)
    zero_blk = jnp.zeros((Co, Ci), jnp.float32)
    blocks = []
    for py in range(s):
        for px in range(s):
            for ty in range(Rk):
                ky = py + pad - s * (ty + ry_lo)
                for tx in range(Rk):
                    kx = px + pad - s * (tx + ry_lo)
                    if 0 <= ky < K and 0 <= kx < K:
                        blocks.append(jnp.transpose(wt_f[:, :, ky, kx]))   # (Co, Ci)
                    else:
                        blocks.append(zero_blk)
    w_all = jnp.stack(blocks, 0).reshape(s, s, Rk, Rk, Co, Ci)
    w_all = jnp.transpose(w_all, (4, 0, 1, 2, 3, 5)).reshape(R, Kraw)
    if Kc != Kraw:
        w_all = jnp.pad(w_all, ((0, 0), (0, Kc - Kraw)))
    w_all = w_all.astype(jnp.bfloat16)

    gamma_rows = jnp.repeat(gamma.astype(jnp.float32), s2n).reshape(R, 1)
    beta_rows = jnp.repeat(beta.astype(jnp.float32), s2n).reshape(R, 1)

    kernel = functools.partial(_deconv_gn_relu_kernel, num_groups=G, eps=eps)
    out = pl.pallas_call(
        kernel,
        out_shape=jax.ShapeDtypeStruct((N, R, Qp), jnp.float32),
        grid=(N,),                               # groups & phases folded into the block
        in_specs=[
            pl.BlockSpec((None, Kc, Qp), lambda n: (n, 0, 0)),   # patches per batch
            pl.BlockSpec((R, Kc), lambda n: (0, 0)),             # weights: resident
            pl.BlockSpec((R, 1), lambda n: (0, 0)),              # gamma:   resident
            pl.BlockSpec((R, 1), lambda n: (0, 0)),              # beta:    resident
        ],
        out_specs=pl.BlockSpec((None, R, Qp), lambda n: (n, 0, 0)),
        compiler_params=pltpu.CompilerParams(
            dimension_semantics=("parallel",)),                  # megacore on batch
    )(patches, w_all, gamma_rows, beta_rows)

    # Depth-to-space (pixel shuffle) of the phase axis back into NCHW.
    out = out.reshape(N, Co, s, s, Qy, Qx)
    out = jnp.transpose(out, (0, 1, 4, 2, 5, 3)).reshape(N, Co, Ho, Wo)
    return out


# ------------------------------ pure-JAX reference ---------------------------- #
def _reference(x, w_t, gamma, beta, *, stride, pad, output_pad, num_groups, eps=1e-5):
    Ci, Co, K, _ = w_t.shape
    lo = K - 1 - pad
    hi = K - 1 - pad + output_pad
    w_conv = jnp.transpose(jnp.flip(jnp.flip(w_t, 2), 3), (1, 0, 2, 3))
    y = lax.conv_general_dilated(
        x, w_conv, window_strides=(1, 1), padding=[(lo, hi), (lo, hi)],
        lhs_dilation=(stride, stride),
        dimension_numbers=("NCHW", "OIHW", "NCHW"))
    N, C, H, W = y.shape
    yg = y.reshape(N, num_groups, C // num_groups, H, W)
    mean = yg.mean(axis=(2, 3, 4), keepdims=True)
    var = ((yg - mean) ** 2).mean(axis=(2, 3, 4), keepdims=True)
    yn = ((yg - mean) / jnp.sqrt(var + eps)).reshape(N, C, H, W)
    out = yn * gamma.reshape(1, C, 1, 1) + beta.reshape(1, C, 1, 1)
    return jnp.maximum(out, 0.0)


if __name__ == "__main__":
    # ConvTransGnReLU(in_channels=4, out_channels=16, kernel_size=3,
    #                 stride=2, pad=1, output_pad=1)
    # (PyTorch requires output_padding < stride, so the usable upsampling config
    #  uses stride=2.)
    N, Ci, H, W = 2, 4, 16, 16
    Co, K, stride, pad, output_pad = 16, 3, 2, 1, 1
    G = max(1, Co // 8)                           # GroupNorm groups per the module

    keys = jax.random.split(jax.random.PRNGKey(0), 4)
    x = jax.random.normal(keys[0], (N, Ci, H, W), jnp.float32)
    bound = 1.0 / (Ci * K * K) ** 0.5
    w_t = jax.random.uniform(keys[1], (Ci, Co, K, K), jnp.float32, -bound, bound)
    gamma = 1.0 + 0.1 * jax.random.normal(keys[2], (Co,), jnp.float32)
    beta = 0.1 * jax.random.normal(keys[3], (Co,), jnp.float32)

    fwd = jax.jit(functools.partial(conv_transpose_gn_relu, stride=stride, pad=pad,
                                    output_pad=output_pad, num_groups=G))
    out = fwd(x, w_t, gamma, beta)
    jax.block_until_ready(out)
    assert out.shape == (N, Co, 2 * H, 2 * W), out.shape

    # Tight check vs a reference whose GEMM operands are also bf16-rounded
    # (isolates layout / decomposition bugs from pure dtype noise).
    xb = x.astype(jnp.bfloat16).astype(jnp.float32)
    wb = w_t.astype(jnp.bfloat16).astype(jnp.float32)
    ref_b = _reference(xb, wb, gamma, beta, stride=stride, pad=pad,
                       output_pad=output_pad, num_groups=G)
    err_b = float(jnp.max(jnp.abs(out - ref_b)))
    assert err_b < 2e-2, f"bf16-operand reference max abs err = {err_b}"

    # Loose check vs the pure-f32 reference (bf16 operand rounding only).
    ref_f = _reference(x, w_t, gamma, beta, stride=stride, pad=pad,
                       output_pad=output_pad, num_groups=G)
    err_f = float(jnp.max(jnp.abs(out - ref_f)))
    assert err_f < 0.2, f"f32 reference max abs err = {err_f}"

    print("KERNEL_OK")
</pallas_src>

<mosaic_0001>
module attributes {stable_mosaic.version = 11 : i64} {
  func.func @_deconv_gn_relu_kernel(%arg0: i32, %arg1: memref<1x16x256xbf16, #tpu.memory_space<vmem>>, %arg2: memref<64x16xbf16, #tpu.memory_space<vmem>>, %arg3: memref<64x1xf32, #tpu.memory_space<vmem>>, %arg4: memref<64x1xf32, #tpu.memory_space<vmem>>, %arg5: memref<1x64x256xf32, #tpu.memory_space<vmem>>) attributes {dimension_semantics = [#tpu.dimension_semantics<parallel>], iteration_bounds = array<i64: 2>, scalar_prefetch = 0 : i64, scratch_operands = 0 : i64, tpu.core_type = #tpu.core_type<tc>, window_params = [{transform_indices = @transform_0, window_bounds = array<i64: 1, 16, 256>}, {pipeline_mode = #tpu.pipeline_mode<synchronous>, transform_indices = @transform_1, window_bounds = array<i64: 64, 16>}, {pipeline_mode = #tpu.pipeline_mode<synchronous>, transform_indices = @transform_2, window_bounds = array<i64: 64, 1>}, {pipeline_mode = #tpu.pipeline_mode<synchronous>, transform_indices = @transform_3, window_bounds = array<i64: 64, 1>}, {transform_indices = @transform_4, window_bounds = array<i64: 1, 64, 256>}]} {
    %c0 = arith.constant 0 : index
    %c0_0 = arith.constant 0 : index
    %0 = vector.load %arg2[%c0, %c0_0] : memref<64x16xbf16, #tpu.memory_space<vmem>>, vector<64x16xbf16>
    %c0_1 = arith.constant 0 : index
    %c0_2 = arith.constant 0 : index
    %c0_3 = arith.constant 0 : index
    %1 = vector.load %arg1[%c0_1, %c0_2, %c0_3] : memref<1x16x256xbf16, #tpu.memory_space<vmem>>, vector<1x16x256xbf16>
    %2 = vector.shape_cast %1 : vector<1x16x256xbf16> to vector<16x256xbf16>
    %cst = arith.constant dense<0.000000e+00> : vector<64x256xf32>
    %3 = tpu.matmul %0, %2, %cst {dimension_numbers = #tpu.dot_dimension_numbers<[1], [0], [0], [1], [0, 0, 1, 1], [], []>} : vector<64x16xbf16>, vector<16x256xbf16>, vector<64x256xf32> -> vector<64x256xf32>
    %4 = vector.extract_strided_slice %3 {offsets = [0, 0], sizes = [32, 256], strides = [1, 1]} : vector<64x256xf32> to vector<32x256xf32>
    %5 = vector.shape_cast %4 : vector<32x256xf32> to vector<1x32x256xf32>
    %cst_4 = arith.constant dense<0.000000e+00> : vector<1xf32>
    %6 = vector.multi_reduction <add>, %5, %cst_4 [1, 2] : vector<1x32x256xf32> to vector<1xf32>
    %7 = vector.shape_cast %6 : vector<1xf32> to vector<1x1x1xf32>
    %8 = vector.extract %7[0, 0, 0] : f32 from vector<1x1x1xf32>
    %9 = vector.broadcast %8 : f32 to vector<1x1xf32>
    %10 = arith.mulf %4, %4 : vector<32x256xf32>
    %11 = vector.shape_cast %10 : vector<32x256xf32> to vector<1x32x256xf32>
    %cst_5 = arith.constant dense<0.000000e+00> : vector<1xf32>
    %12 = vector.multi_reduction <add>, %11, %cst_5 [1, 2] : vector<1x32x256xf32> to vector<1xf32>
    %13 = vector.shape_cast %12 : vector<1xf32> to vector<1x1x1xf32>
    %14 = vector.extract %13[0, 0, 0] : f32 from vector<1x1x1xf32>
    %15 = vector.broadcast %14 : f32 to vector<1x1xf32>
    %cst_6 = arith.constant 1.22070313E-4 : f32
    %16 = vector.broadcast %cst_6 : f32 to vector<1x1xf32>
    %17 = arith.mulf %9, %16 : vector<1x1xf32>
    %cst_7 = arith.constant 1.22070313E-4 : f32
    %18 = vector.broadcast %cst_7 : f32 to vector<1x1xf32>
    %19 = arith.mulf %15, %18 : vector<1x1xf32>
    %20 = arith.mulf %17, %17 : vector<1x1xf32>
    %21 = arith.subf %19, %20 : vector<1x1xf32>
    %cst_8 = arith.constant 0.000000e+00 : f32
    %22 = vector.broadcast %cst_8 : f32 to vector<1x1xf32>
    %23 = arith.maximumf %21, %22 : vector<1x1xf32>
    %cst_9 = arith.constant 9.99999974E-6 : f32
    %24 = vector.broadcast %cst_9 : f32 to vector<1x1xf32>
    %25 = arith.addf %23, %24 : vector<1x1xf32>
    %26 = math.rsqrt %25 : vector<1x1xf32>
    %c0_10 = arith.constant 0 : index
    %c0_11 = arith.constant 0 : index
    %27 = vector.load %arg3[%c0_10, %c0_11] : memref<64x1xf32, #tpu.memory_space<vmem>>, vector<32x1xf32>
    %28 = vector.broadcast %26 : vector<1x1xf32> to vector<32x1xf32>
    %29 = arith.mulf %27, %28 : vector<32x1xf32>
    %c0_12 = arith.constant 0 : index
    %c0_13 = arith.constant 0 : index
    %30 = vector.load %arg4[%c0_12, %c0_13] : memref<64x1xf32, #tpu.memory_space<vmem>>, vector<32x1xf32>
    %31 = vector.broadcast %17 : vector<1x1xf32> to vector<32x1xf32>
    %32 = arith.mulf %31, %29 : vector<32x1xf32>
    %33 = arith.subf %30, %32 : vector<32x1xf32>
    %34 = vector.broadcast %29 : vector<32x1xf32> to vector<32x256xf32>
    %35 = arith.mulf %4, %34 : vector<32x256xf32>
    %36 = vector.broadcast %33 : vector<32x1xf32> to vector<32x256xf32>
    %37 = arith.addf %35, %36 : vector<32x256xf32>
    %cst_14 = arith.constant 0.000000e+00 : f32
    %38 = vector.broadcast %cst_14 : f32 to vector<32x256xf32>
    %39 = arith.maximumf %37, %38 : vector<32x256xf32>
    %c0_15 = arith.constant 0 : index
    %c0_16 = arith.constant 0 : index
    %c0_17 = arith.constant 0 : index
    %40 = vector.load %arg5[%c0_15, %c0_16, %c0_17] : memref<1x64x256xf32, #tpu.memory_space<vmem>>, vector<1x32x256xf32>
    %41 = vector.shape_cast %40 : vector<1x32x256xf32> to vector<32x256xf32>
    %42 = vector.shape_cast %39 : vector<32x256xf32> to vector<1x32x256xf32>
    tpu.vector_store %arg5[%c0_15, %c0_16, %c0_17], %42 {strides = array<i32>} : memref<1x64x256xf32, #tpu.memory_space<vmem>>, vector<1x32x256xf32>,
    %43 = vector.extract_strided_slice %3 {offsets = [32, 0], sizes = [32, 256], strides = [1, 1]} : vector<64x256xf32> to vector<32x256xf32>
    %44 = vector.shape_cast %43 : vector<32x256xf32> to vector<1x32x256xf32>
    %cst_18 = arith.constant dense<0.000000e+00> : vector<1xf32>
    %45 = vector.multi_reduction <add>, %44, %cst_18 [1, 2] : vector<1x32x256xf32> to vector<1xf32>
    %46 = vector.shape_cast %45 : vector<1xf32> to vector<1x1x1xf32>
    %47 = vector.extract %46[0, 0, 0] : f32 from vector<1x1x1xf32>
    %48 = vector.broadcast %47 : f32 to vector<1x1xf32>
    %49 = arith.mulf %43, %43 : vector<32x256xf32>
    %50 = vector.shape_cast %49 : vector<32x256xf32> to vector<1x32x256xf32>
    %cst_19 = arith.constant dense<0.000000e+00> : vector<1xf32>
    %51 = vector.multi_reduction <add>, %50, %cst_19 [1, 2] : vector<1x32x256xf32> to vector<1xf32>
    %52 = vector.shape_cast %51 : vector<1xf32> to vector<1x1x1xf32>
    %53 = vector.extract %52[0, 0, 0] : f32 from vector<1x1x1xf32>
    %54 = vector.broadcast %53 : f32 to vector<1x1xf32>
    %cst_20 = arith.constant 1.22070313E-4 : f32
    %55 = vector.broadcast %cst_20 : f32 to vector<1x1xf32>
    %56 = arith.mulf %48, %55 : vector<1x1xf32>
    %cst_21 = arith.constant 1.22070313E-4 : f32
    %57 = vector.broadcast %cst_21 : f32 to vector<1x1xf32>
    %58 = arith.mulf %54, %57 : vector<1x1xf32>
    %59 = arith.mulf %56, %56 : vector<1x1xf32>
    %60 = arith.subf %58, %59 : vector<1x1xf32>
    %cst_22 = arith.constant 0.000000e+00 : f32
    %61 = vector.broadcast %cst_22 : f32 to vector<1x1xf32>
    %62 = arith.maximumf %60, %61 : vector<1x1xf32>
    %cst_23 = arith.constant 9.99999974E-6 : f32
    %63 = vector.broadcast %cst_23 : f32 to vector<1x1xf32>
    %64 = arith.addf %62, %63 : vector<1x1xf32>
    %65 = math.rsqrt %64 : vector<1x1xf32>
    %c32 = arith.constant 32 : index
    %c0_24 = arith.constant 0 : index
    %66 = vector.load %arg3[%c32, %c0_24] : memref<64x1xf32, #tpu.memory_space<vmem>>, vector<32x1xf32>
    %67 = vector.broadcast %65 : vector<1x1xf32> to vector<32x1xf32>
    %68 = arith.mulf %66, %67 : vector<32x1xf32>
    %c32_25 = arith.constant 32 : index
    %c0_26 = arith.constant 0 : index
    %69 = vector.load %arg4[%c32_25, %c0_26] : memref<64x1xf32, #tpu.memory_space<vmem>>, vector<32x1xf32>
    %70 = vector.broadcast %56 : vector<1x1xf32> to vector<32x1xf32>
    %71 = arith.mulf %70, %68 : vector<32x1xf32>
    %72 = arith.subf %69, %71 : vector<32x1xf32>
    %73 = vector.broadcast %68 : vector<32x1xf32> to vector<32x256xf32>
    %74 = arith.mulf %43, %73 : vector<32x256xf32>
    %75 = vector.broadcast %72 : vector<32x1xf32> to vector<32x256xf32>
    %76 = arith.addf %74, %75 : vector<32x256xf32>
    %cst_27 = arith.constant 0.000000e+00 : f32
    %77 = vector.broadcast %cst_27 : f32 to vector<32x256xf32>
    %78 = arith.maximumf %76, %77 : vector<32x256xf32>
    %c0_28 = arith.constant 0 : index
    %c32_29 = arith.constant 32 : index
    %c0_30 = arith.constant 0 : index
    %79 = vector.load %arg5[%c0_28, %c32_29, %c0_30] : memref<1x64x256xf32, #tpu.memory_space<vmem>>, vector<1x32x256xf32>
    %80 = vector.shape_cast %79 : vector<1x32x256xf32> to vector<32x256xf32>
    %81 = vector.shape_cast %78 : vector<32x256xf32> to vector<1x32x256xf32>
    tpu.vector_store %arg5[%c0_28, %c32_29, %c0_30], %81 {strides = array<i32>} : memref<1x64x256xf32, #tpu.memory_space<vmem>>, vector<1x32x256xf32>,
    return
  }
  func.func @transform_0(%arg0: i32) -> (i32, i32, i32) {
    %c0_i32 = arith.constant 0 : i32
    %c0_i32_0 = arith.constant 0 : i32
    %c0_i32_1 = arith.constant 0 : i32
    return %arg0, %c0_i32, %c0_i32_0 : i32, i32, i32
  }
  func.func @transform_1(%arg0: i32) -> (i32, i32) {
    %c0_i32 = arith.constant 0 : i32
    %c0_i32_0 = arith.constant 0 : i32
    %c0_i32_1 = arith.constant 0 : i32
    return %c0_i32, %c0_i32_0 : i32, i32
  }
  func.func @transform_2(%arg0: i32) -> (i32, i32) {
    %c0_i32 = arith.constant 0 : i32
    %c0_i32_0 = arith.constant 0 : i32
    %c0_i32_1 = arith.constant 0 : i32
    return %c0_i32, %c0_i32_0 : i32, i32
  }
  func.func @transform_3(%arg0: i32) -> (i32, i32) {
    %c0_i32 = arith.constant 0 : i32
    %c0_i32_0 = arith.constant 0 : i32
    %c0_i32_1 = arith.constant 0 : i32
    return %c0_i32, %c0_i32_0 : i32, i32
  }
  func.func @transform_4(%arg0: i32) -> (i32, i32, i32) {
    %c0_i32 = arith.constant 0 : i32
    %c0_i32_0 = arith.constant 0 : i32
    %c0_i32_1 = arith.constant 0 : i32
    return %arg0, %c0_i32, %c0_i32_0 : i32, i32, i32
  }
}

</mosaic_0001>

<bundles_post_ra>
// kernel: conv_transpose_gn_relu.1
= control target key start
LH: loop header
LB: loop body
LE: loop exit
PB: predicated region body
PF: predicated region fallthrough
CT: control target
= control target key end

     0   :  { %s776_s15 = smov 0   ;;  %s987_s0 = inlined_call_operand.vmem [shape: bf16[2,16,256], index: 0, kind: input, shape index: {}]   ;;  %s988_s1 = inlined_call_operand.vmem [shape: bf16[64,16], index: 1, kind: input, shape index: {}]   ;;  %s989_s2 = inlined_call_operand.vmem [shape: f32[64,1], index: 2, kind: input, shape index: {}]   ;;  %s990_s3 = inlined_call_operand.vmem [shape: f32[64,1], index: 3, kind: input, shape index: {}]   ;;  %s991_s4 = inlined_call_operand.vmem [shape: f32[2,64,256], index: 4, kind: output, shape index: {}]  }
   0x1 LB: > { %s665_s16 = sadd.s32 4294967295, %s748_s15   ;;  %p669_p0 = scmp.ge.s32.totalorder %s748_s15, 1  ;;  %s748_s15 = sphi %s776_s15, %s14_s15  }
   0x2   : > { %p162_p1 = scmp.lt.s32.totalorder %s748_s15, 3 }
   0x4   : > { %p163_p2 = pnand %p669_p0, %p162_p1 }
   0x5   : > { %p188_p3 = scmp.lt.s32.totalorder (!%p163_p2), %s665_s16, 1 }
   0x6   : > { %166 = sbr.rel (%p163_p2) target bundleno = 551 (0x227), region = 36 }
   0xb   : > { %s993_s16 = smov (!%p188_p3, %s665_s16), 1  ;;  %v710_v6 = vld [vmem:[%s988_s1] sm:$0xff]  ;;  %v712_v7 = vld [vmem:[%s988_s1 + $0x10] sm:$0xff]  ;;  %vm239_vm0 = vcmask 130048   ;;  %v711_v8 = vld [vmem:[%s988_s1 + $0x8] sm:$0xff] }
   0xc   : > { %s708_s17 = sshll.u32 %s993_s16, 4  ;;  %v713_v9 = vld [vmem:[%s988_s1 + $0x18] sm:$0xff] }
   0xd   : > { %s192_s20 = scalar_lea.vmem %s987_s0, %s708_s17  ;;  %s709_s17 = sshll.u32 %s993_s16, 7 }
   0xe   : > { %v692_v0 = vld [vmem:[%s192_s20] sm:$0xf]  ;;  %v715_v1 = vld [vmem:[%s192_s20 + $0x4] sm:$0xf0]  ;;  %v714_v2 = vld [vmem:[%s192_s20 + $0x4] sm:$0xf] }
   0xf   : > { %v693_v3 = vor.u32 %v715_v1, %v692_v0  ;;  %v694_v4 = vld [vmem:[%s192_s20 + $0x8] sm:$0xf0]  ;;  %s952_s20 = scalar_lea.vmem %s991_s4, %s709_s17 }
  0x10   : > { %v697_v5 = vor.u32 %v714_v2, %v694_v4 }
  0x11   : > { %259 = vmatpush.bf16.msra.mxu0 %v693_v3  ;;  %716 = vmatpush.bf16.msra.mxu2 %v693_v3 }
  0x12   : > { %288 = vmatpush.bf16.msra.mxu1 %v697_v5  ;;  %717 = vmatpush.bf16.msra.mxu3 %v697_v5 }
  0x14   : > { %698 = vmatmul.msk.bf16.vlgmr.msra.gmra.mxu0 %vm239_vm0, %v710_v6  ;;  %700 = vmatmul.msk.bf16.vlgmr.msra.gmra.mxu2 %vm239_vm0, %v712_v7 }
  0x15   : > { %702 = vmatmul.msk.bf16.vlgmr.msra.gmra.mxu1 %vm239_vm0, %v710_v6  ;;  %704 = vmatmul.msk.bf16.vlgmr.msra.gmra.mxu3 %vm239_vm0, %v712_v7 }
  0x24   : > { %699 = vmatmul.msk.bf16.gmra.mxu0 %vm239_vm0, %v711_v8  ;;  %701 = vmatmul.msk.bf16.gmra.mxu2 %vm239_vm0, %v713_v9 }
  0x25   : > { %703 = vmatmul.msk.bf16.gmra.mxu1 %vm239_vm0, %v711_v8  ;;  %705 = vmatmul.msk.bf16.gmra.mxu3 %vm239_vm0, %v713_v9 }
  0x91   : > { %v802_v10 = vpop.f32.mrf.mxu0 }
  0x92   : > { %v804_v11 = vpop.f32.mrf.mxu1  ;;  %v327_v18 = vmul.f32 %v802_v10, %v802_v10 }
  0x93   : > { %v310_v16 = vadd.f32 %v804_v11, %v802_v10  ;;  %v328_v19 = vmul.f32 %v804_v11, %v804_v11 }
  0x95   : > { %v335_v28 = vadd.f32 %v328_v19, %v327_v18 }
  0x97   : > { %v806_v12 = vpop.f32.mrf.mxu2 }
  0x98   : > { %v808_v13 = vpop.f32.mrf.mxu3  ;;  %v477_v20 = vmul.f32 %v806_v12, %v806_v12 }
  0x99   : > { %v810_v14 = vpop.f32.mrf.mxu0  ;;  %v460_v17 = vadd.f32 %v808_v13, %v806_v12  ;;  %v478_v22 = vmul.f32 %v808_v13, %v808_v13 }
  0x9a   : > { %v812_v15 = vpop.f32.mrf.mxu1  ;;  %v311_v21 = vadd.f32 %v310_v16, %v810_v14  ;;  %v329_v24 = vmul.f32 %v810_v14, %v810_v14 }
  0x9b   : > { %v485_v30 = vadd.f32 %v478_v22, %v477_v20  ;;  %v330_v36 = vmul.f32 %v812_v15, %v812_v15 }
  0x9c   : > { %v312_v29 = vadd.f32 %v311_v21, %v812_v15  ;;  %v336_v33 = vadd.f32 %v335_v28, %v329_v24 }
  0x9e   : > { %v337_v41 = vadd.f32 %v336_v33, %v330_v36 }
  0x9f   : > { %v827_v23 = vpop.f32.mrf.mxu2 }
  0xa0   : > { %v461_v25 = vadd.f32 %v460_v17, %v827_v23  ;;  %v832_v26 = vpop.f32.mrf.mxu3  ;;  %v479_v31 = vmul.f32 %v827_v23, %v827_v23 }
  0xa1   : > { %v834_v27 = vpop.f32.mrf.mxu0  ;;  %v480_v39 = vmul.f32 %v832_v26, %v832_v26 }
  0xa2   : > { %v839_v32 = vpop.f32.mrf.mxu1  ;;  %v313_v34 = vadd.f32 %v312_v29, %v834_v27  ;;  %v462_v35 = vadd.f32 %v461_v25, %v832_v26  ;;  %v486_v37 = vadd.f32 %v485_v30, %v479_v31  ;;  %v331_v38 = vmul.f32 %v834_v27, %v834_v27 }
  0xa3   : > { %v332_v45 = vmul.f32 %v839_v32, %v839_v32 }
  0xa4   : > { %v314_v42 = vadd.f32 %v313_v34, %v839_v32  ;;  %v338_v47 = vadd.f32 %v337_v41, %v331_v38  ;;  %v487_v48 = vadd.f32 %v486_v37, %v480_v39 }
  0xa6   : > { %v339_v57 = vadd.f32 %v338_v47, %v332_v45 }
  0xa7   : > { %v849_v40 = vpop.f32.mrf.mxu2 }
  0xa8   : > { %v463_v43 = vadd.f32 %v462_v35, %v849_v40  ;;  %v853_v44 = vpop.f32.mrf.mxu3  ;;  %v481_v49 = vmul.f32 %v849_v40, %v849_v40 }
  0xa9   : > { %v857_v46 = vpop.f32.mrf.mxu0  ;;  %v482_v56 = vmul.f32 %v853_v44, %v853_v44 }
  0xaa   : > { %v315_v50 = vadd.f32 %v314_v42, %v857_v46  ;;  %v862_v51 = vpop.f32.mrf.mxu1  ;;  %v333_v52 = vmul.f32 %v857_v46, %v857_v46  ;;  %v464_v53 = vadd.f32 %v463_v43, %v853_v44  ;;  %v488_v55 = vadd.f32 %v487_v48, %v481_v49 }
  0xab   : > { %v334_v62 = vmul.f32 %v862_v51, %v862_v51  ;;  %v750_v49 = vmov 0  }
  0xac   : > { %v316_v54 = vadd.f32 %v315_v50, %v862_v51  ;;  %v340_v61 = vadd.f32 %v339_v57, %v333_v52  ;;  %v489_v1 = vadd.f32 %v488_v55, %v482_v56  ;;  %737 = vset.pattern.permute.xlu1 %v750_v49  ;;  %736 = vset.pattern.permute.xlu0 %v750_v49 }
  0xad   : > { %735 = vset.pattern.permute.xlu2 %v750_v49  ;;  %v376_v49 = vld [vmem:[%s990_s3] sm:$0xff] }
  0xae   : > { %317 = vadd.xlane.f32.xlu0 %v316_v54  ;;  %v341_v2 = vadd.f32 %v340_v61, %v334_v62 }
  0xaf   : > { %v870_v58 = vpop.f32.mrf.mxu2 }
  0xb0   : > { %v465_v59 = vadd.f32 %v464_v53, %v870_v58  ;;  %v873_v60 = vpop.f32.mrf.mxu3  ;;  %v483_v63 = vmul.f32 %v870_v58, %v870_v58 }
  0xb1   : > { %v484_v3 = vmul.f32 %v873_v60, %v873_v60 }
  0xb2   : > { %v466_v0 = vadd.f32 %v465_v59, %v873_v60  ;;  %v490_v4 = vadd.f32 %v489_v1, %v483_v63 }
  0xb4   : > { %467 = vadd.xlane.f32.xlu1 %v466_v0  ;;  %v491_v5 = vadd.f32 %v490_v4, %v484_v3 }
  0xb6   : > { %342 = vadd.xlane.f32.xlu0 %v341_v2 }
  0xbc   : > { %492 = vadd.xlane.f32.xlu1 %v491_v5 }
 0x121   : > { %v318_v6 = vpop.xlane.xlu0 %317 }
 0x122   : > { %v319_v7 = vrot.slane %v318_v6, 4 }
 0x124   : > { %v320_v8 = vadd.f32 %v319_v7, %v318_v6 }
 0x126   : > { %v321_v9 = vrot.slane %v320_v8, 2 }
 0x127   : > { %v468_v16 = vpop.xlane.xlu1 %467 }
 0x128   : > { %v469_v17 = vrot.slane %v468_v16, 4  ;;  %v322_v18 = vadd.f32 %v321_v9, %v320_v8 }
 0x129   : > { %v343_v19 = vpop.xlane.xlu0 %342 }
 0x12a   : > { %v470_v20 = vadd.f32 %v469_v17, %v468_v16  ;;  %v344_v21 = vrot.slane %v343_v19, 4  ;;  %v323_v22 = vrot.slane %v322_v18, 1 }
 0x12c   : > { %v471_v24 = vrot.slane %v470_v20, 2  ;;  %v345_v25 = vadd.f32 %v344_v21, %v343_v19  ;;  %v324_v28 = vadd.f32 %v323_v22, %v322_v18  ;;  %v371_v18 = vld [vmem:[%s989_s2 + $0x18] sm:$0xff]  ;;  %v370_v19 = vld [vmem:[%s989_s2 + $0x10] sm:$0xff] }
 0x12e   : > { %v346_v29 = vrot.slane %v345_v25, 2  ;;  %718 = vpush %v324_v28  ;;  %v472_v30 = vadd.f32 %v471_v24, %v470_v20  ;;  %v368_v20 = vld [vmem:[%s989_s2] sm:$0xff] }
 0x12f   : > { %v493_v31 = vpop.xlane.xlu1 %492 }
 0x130   : > { %v494_v33 = vrot.slane %v493_v31, 4  ;;  %v347_v34 = vadd.f32 %v346_v29, %v345_v25  ;;  %v473_v35 = vrot.slane %v472_v30, 1 }
 0x132   : > { %v495_v36 = vadd.f32 %v494_v33, %v493_v31  ;;  %v348_v37 = vrot.slane %v347_v34, 1  ;;  %v474_v41 = vadd.f32 %v473_v35, %v472_v30  ;;  %v518_v33 = vld [vmem:[%s989_s2 + $0x20] sm:$0xff]  ;;  %v520_v35 = vld [vmem:[%s989_s2 + $0x30] sm:$0xff] }
 0x134   : > { %v496_v38 = vrot.slane %v495_v36, 2  ;;  %v349_v39 = vadd.f32 %v348_v37, %v347_v34  ;;  %v521_v34 = vld [vmem:[%s989_s2 + $0x38] sm:$0xff] }
 0x136   : > { %720 = vpush %v349_v39  ;;  %v497_v42 = vadd.f32 %v496_v38, %v495_v36  ;;  %v369_v36 = vld [vmem:[%s989_s2 + $0x8] sm:$0xff] }
 0x137   : > { %722 = vpush %v474_v41 }
 0x138   : > { %v498_v43 = vrot.slane %v497_v42, 1 }
 0x13a   : > { %v499_v45 = vadd.f32 %v498_v43, %v497_v42 }
 0x13c   : > { %724 = vpush %v499_v45  ;;  %v528_v45 = vld [vmem:[%s990_s3 + $0x30] sm:$0xff] }
 0x15f   : > { %s719_s29 = spop %718 }
 0x160   : > { %v326_v47 = vstv %s719_s29 }
 0x161   : > { %v882_v48 = vmul.f32 0.00012207031, %v326_v47  ;;  %v519_v47 = vld [vmem:[%s989_s2 + $0x28] sm:$0xff] }
 0x163   : > { %v354_v53 = vmul.f32 %v882_v48, %v882_v48 }
 0x167   : > { %s721_s30 = spop %720 }
 0x168   : > { %v351_v50 = vstv %s721_s30  ;;  %s723_s5 = spop %722 }
 0x169   : > { %v353_v52 = vmul.f32 0.00012207031, %v351_v50  ;;  %v476_v54 = vstv %s723_s5 }
 0x16a   : > { %v886_v56 = vmul.f32 0.00012207031, %v476_v54 }
 0x16b   : > { %v355_v55 = vsub.f32 %v353_v52, %v354_v53 }
 0x16c   : > { %v504_v63 = vmul.f32 %v886_v56, %v886_v56 }
 0x16d   : > { %v356_v57 = vmax.f32 %v355_v55, 0.0  ;;  %s725_s6 = spop %724  ;;  %v527_v55 = vld [vmem:[%s990_s3 + $0x28] sm:$0xff] }
 0x16e   : > { %v501_v59 = vstv %s725_s6 }
 0x16f   : > { %v357_v61 = vadd.f32 1e-05, %v356_v57  ;;  %v503_v62 = vmul.f32 0.00012207031, %v501_v59  ;;  %v377_v59 = vld [vmem:[%s990_s3 + $0x8] sm:$0xff] }
 0x171   : > { %738 = vrsqrt.f32 %v357_v61  ;;  %v505_v0 = vsub.f32 %v503_v62, %v504_v63  ;;  %vm364_vm2 = vweird.f32 %v357_v61 }
 0x173   : > { %v506_v1 = vmax.f32 %v505_v0, 0.0  ;;  %v378_v0 = vld [vmem:[%s990_s3 + $0x10] sm:$0xff] }
 0x175   : > { %v507_v2 = vadd.f32 1e-05, %v506_v1 }
 0x177   : > { %v739_v3 = vpop.eup %738  ;;  %740 = vrsqrt.f32 %v507_v2  ;;  %vm514_vm5 = vweird.f32 %v507_v2 }
 0x178   : > { %v359_v4 = vmul.f32 %v739_v3, %v357_v61  ;;  %vm365_vm1 = vweird.f32 %v739_v3 }
 0x179   : > { %vm366_vm3 = vmor %vm364_vm2, %vm365_vm1 }
 0x17a   : > { %v360_v5 = vmul.f32 %v739_v3, %v359_v4 }
 0x17c   : > { %v361_v6 = vmul.f32 0.5, %v360_v5 }
 0x17d   : > { %v741_v7 = vpop.eup %740 }
 0x17e   : > { %v362_v8 = vsub.f32 1.5, %v361_v6  ;;  %v509_v9 = vmul.f32 %v741_v7, %v507_v2  ;;  %vm515_vm4 = vweird.f32 %v741_v7  ;;  %v526_v6 = vld [vmem:[%s990_s3 + $0x20] sm:$0xff] }
 0x17f   : > { %vm516_vm6 = vmor %vm514_vm5, %vm515_vm4 }
 0x180   : > { %v510_v16 = vmul.f32 %v741_v7, %v509_v9  ;;  %v363_v17 = vmul.f32 %v739_v3, %v362_v8 }
 0x182   : > { %v511_v21 = vmul.f32 0.5, %v510_v16  ;;  %v367_v22 = vsel %vm366_vm3, %v739_v3, %v363_v17  ;;  %v379_v3 = vld [vmem:[%s990_s3 + $0x18] sm:$0xff] }
 0x183   : > { %v375_v24 = vmul.f32 %v371_v18, %v367_v22  ;;  %v374_v25 = vmul.f32 %v370_v19, %v367_v22  ;;  %v372_v28 = vmul.f32 %v368_v20, %v367_v22  ;;  %v373_v41 = vmul.f32 %v369_v36, %v367_v22 }
 0x184   : > { %v512_v29 = vsub.f32 1.5, %v511_v21 }
 0x185   : > { %405 = vperm.xlu1 %737, %v375_v24   ;;  %400 = vperm.xlu0 %736, %v374_v25   ;;  %v380_v43 = vmul.f32 %v372_v28, %v882_v48  ;;  %v381_v57 = vmul.f32 %v373_v41, %v882_v48  ;;  %v382_v63 = vmul.f32 %v374_v25, %v882_v48 }
 0x186   : > { %390 = vperm.xlu2 %735, %v372_v28   ;;  %v513_v30 = vmul.f32 %v741_v7, %v512_v29  ;;  %v383_v2 = vmul.f32 %v375_v24, %v882_v48  ;;  %v529_v48 = vld [vmem:[%s990_s3 + $0x38] sm:$0xff] }
 0x187   : > { %v384_v53 = vsub.f32 %v376_v49, %v380_v43  ;;  %v385_v62 = vsub.f32 %v377_v59, %v381_v57  ;;  %v386_v1 = vsub.f32 %v378_v0, %v382_v63 }
 0x188   : > { %v517_v31 = vsel %vm516_vm6, %v741_v7, %v513_v30  ;;  %v387_v4 = vsub.f32 %v379_v3, %v383_v2 }
 0x189   : > { %v522_v37 = vmul.f32 %v518_v33, %v517_v31  ;;  %v525_v38 = vmul.f32 %v521_v34, %v517_v31  ;;  %v524_v39 = vmul.f32 %v520_v35, %v517_v31  ;;  %v523_v52 = vmul.f32 %v519_v47, %v517_v31 }
 0x18b   : > { %v532_v42 = vmul.f32 %v524_v39, %v886_v56  ;;  %v531_v54 = vmul.f32 %v523_v52, %v886_v56  ;;  %v530_v5 = vmul.f32 %v522_v37, %v886_v56  ;;  %v533_v8 = vmul.f32 %v525_v38, %v886_v56 }
 0x18d   : > { %540 = vperm.xlu1 %737, %v522_v37   ;;  %555 = vperm.xlu0 %736, %v525_v38   ;;  %v536_v50 = vsub.f32 %v528_v45, %v532_v42  ;;  %v535_v61 = vsub.f32 %v527_v55, %v531_v54  ;;  %v534_v7 = vsub.f32 %v526_v6, %v530_v5 }
 0x18e   : > { %395 = vperm.xlu2 %735, %v373_v41   ;;  %v537_v9 = vsub.f32 %v529_v48, %v533_v8 }
 0x195   : > { %550 = vperm.xlu1 %737, %v524_v39   ;;  %578 = vperm.xlu0 %736, %v536_v50  }
 0x196   : > { %418 = vperm.xlu2 %735, %v384_v53  }
 0x19d   : > { %573 = vperm.xlu1 %737, %v535_v61  }
 0x19e   : > { %423 = vperm.xlu2 %735, %v385_v62  }
 0x1a6   : > { %428 = vperm.xlu2 %735, %v386_v1  }
 0x1ae   : > { %433 = vperm.xlu2 %735, %v387_v4  }
 0x1b6   : > { %545 = vperm.xlu2 %735, %v523_v52  }
 0x1be   : > { %568 = vperm.xlu2 %735, %v534_v7  }
 0x1c6   : > { %583 = vperm.xlu2 %735, %v537_v9  }
 0x1e0   : > { %v391_v16 = vpop.permute.xlu2 %390 }
 0x1e1   : > { %v408_v18 = vmul.f32 %v391_v16, %v802_v10  ;;  %v409_v19 = vmul.f32 %v391_v16, %v804_v11 }
 0x1e8   : > { %v396_v17 = vpop.permute.xlu2 %395 }
 0x1e9   : > { %v410_v10 = vmul.f32 %v396_v17, %v810_v14  ;;  %v411_v11 = vmul.f32 %v396_v17, %v812_v15 }
 0x1f0   : > { %v419_v20 = vpop.permute.xlu2 %418 }
 0x1f1   : > { %v436_v21 = vadd.f32 %v419_v20, %v408_v18  ;;  %v437_v22 = vadd.f32 %v419_v20, %v409_v19 }
 0x1f3   : > { %v444_v56 = vmax.f32 %v436_v21, 0.0  ;;  %v445_v24 = vmax.f32 %v437_v22, 0.0 }
 0x1f5   : > { %452 = vst [vmem:[%s952_s20] sm:$0xff] %v444_v56 }
 0x1f6   : > { %453 = vst [vmem:[%s952_s20 + $0x8] sm:$0xff] %v445_v24 }
 0x1f7   : > { %v406_v25 = vpop.permute.xlu1 %405  ;;  %v401_v28 = vpop.permute.xlu0 %400 }
 0x1f8   : > { %v424_v29 = vpop.permute.xlu2 %423  ;;  %v412_v35 = vmul.f32 %v401_v28, %v834_v27  ;;  %v413_v36 = vmul.f32 %v401_v28, %v839_v32  ;;  %v414_v43 = vmul.f32 %v406_v25, %v857_v46  ;;  %v415_v45 = vmul.f32 %v406_v25, %v862_v51 }
 0x1f9   : > { %v438_v30 = vadd.f32 %v424_v29, %v410_v10  ;;  %v439_v31 = vadd.f32 %v424_v29, %v411_v11 }
 0x1fb   : > { %v446_v33 = vmax.f32 %v438_v30, 0.0  ;;  %v447_v34 = vmax.f32 %v439_v31, 0.0 }
 0x1fd   : > { %454 = vst [vmem:[%s952_s20 + $0x10] sm:$0xff] %v446_v33 }
 0x1fe   : > { %455 = vst [vmem:[%s952_s20 + $0x18] sm:$0xff] %v447_v34 }
 0x1ff   : > { %v541_v37 = vpop.permute.xlu1 %540  ;;  %v556_v38 = vpop.permute.xlu0 %555 }
 0x200   : > { %v429_v14 = vpop.permute.xlu2 %428  ;;  %v558_v3 = vmul.f32 %v541_v37, %v806_v12  ;;  %v559_v4 = vmul.f32 %v541_v37, %v808_v13  ;;  %v565_v48 = vmul.f32 %v556_v38, %v873_v60 }
 0x201   : > { %v440_v39 = vadd.f32 %v429_v14, %v412_v35  ;;  %v441_v15 = vadd.f32 %v429_v14, %v413_v36 }
 0x203   : > { %v448_v41 = vmax.f32 %v440_v39, 0.0  ;;  %v449_v42 = vmax.f32 %v441_v15, 0.0 }
 0x205   : > { %456 = vst [vmem:[%s952_s20 + $0x20] sm:$0xff] %v448_v41 }
 0x206   : > { %457 = vst [vmem:[%s952_s20 + $0x28] sm:$0xff] %v449_v42 }
 0x207   : > { %v551_v47 = vpop.permute.xlu1 %550  ;;  %v579_v50 = vpop.permute.xlu0 %578 }
 0x208   : > { %v562_v27 = vmul.f32 %v551_v47, %v849_v40  ;;  %v563_v32 = vmul.f32 %v551_v47, %v853_v44  ;;  %v434_v49 = vpop.permute.xlu2 %433 }
 0x209   : > { %v442_v52 = vadd.f32 %v434_v49, %v414_v43  ;;  %v443_v53 = vadd.f32 %v434_v49, %v415_v45 }
 0x20a   : > { %v590_v54 = vadd.f32 %v579_v50, %v562_v27  ;;  %v591_v55 = vadd.f32 %v579_v50, %v563_v32 }
 0x20b   : > { %v450_v57 = vmax.f32 %v442_v52, 0.0  ;;  %v451_v46 = vmax.f32 %v443_v53, 0.0 }
 0x20c   : > { %v598_v59 = vmax.f32 %v590_v54, 0.0  ;;  %v599_v61 = vmax.f32 %v591_v55, 0.0 }
 0x20d   : > { %458 = vst [vmem:[%s952_s20 + $0x30] sm:$0xff] %v450_v57 }
 0x20e   : > { %606 = vst [vmem:[%s952_s20 + $0x60] sm:$0xff] %v598_v59 }
 0x20f   : > { %607 = vst [vmem:[%s952_s20 + $0x68] sm:$0xff] %v599_v61  ;;  %v574_v62 = vpop.permute.xlu1 %573 }
 0x210   : > { %459 = vst [vmem:[%s952_s20 + $0x38] sm:$0xff] %v451_v46  ;;  %v546_v51 = vpop.permute.xlu2 %545 }
 0x211   : > { %v560_v40 = vmul.f32 %v546_v51, %v827_v23  ;;  %v561_v44 = vmul.f32 %v546_v51, %v832_v26  ;;  %v564_v26 = vmul.f32 %v556_v38, %v870_v58 }
 0x213   : > { %v588_v63 = vadd.f32 %v574_v62, %v560_v40  ;;  %v589_v0 = vadd.f32 %v574_v62, %v561_v44 }
 0x215   : > { %v596_v1 = vmax.f32 %v588_v63, 0.0  ;;  %v597_v2 = vmax.f32 %v589_v0, 0.0 }
 0x217   : > { %604 = vst [vmem:[%s952_s20 + $0x50] sm:$0xff] %v596_v1 }
 0x218   : > { %605 = vst [vmem:[%s952_s20 + $0x58] sm:$0xff] %v597_v2  ;;  %v569_v5 = vpop.permute.xlu2 %568 }
 0x219   : > { %v586_v6 = vadd.f32 %v569_v5, %v558_v3  ;;  %v587_v23 = vadd.f32 %v569_v5, %v559_v4 }
 0x21b   : > { %v594_v7 = vmax.f32 %v586_v6, 0.0  ;;  %v595_v8 = vmax.f32 %v587_v23, 0.0 }
 0x21d   : > { %602 = vst [vmem:[%s952_s20 + $0x40] sm:$0xff] %v594_v7 }
 0x21e   : > { %603 = vst [vmem:[%s952_s20 + $0x48] sm:$0xff] %v595_v8 }
 0x220   : > { %v584_v9 = vpop.permute.xlu2 %583 }
 0x221   : > { %v592_v16 = vadd.f32 %v584_v9, %v564_v26  ;;  %v593_v12 = vadd.f32 %v584_v9, %v565_v48 }
 0x223   : > { %v600_v17 = vmax.f32 %v592_v16, 0.0  ;;  %v601_v13 = vmax.f32 %v593_v12, 0.0 }
 0x225   : > { %608 = vst [vmem:[%s952_s20 + $0x70] sm:$0xff] %v600_v17 }
 0x226   : > { %609 = vst [vmem:[%s952_s20 + $0x78] sm:$0xff] %v601_v13 }
 0x227 PF: > { %s14_s15 = sadd.s32 1, %s748_s15  }
 0x228   : > { %p11_p4 = scmp.ge.s32.totalorder %s14_s15, 4  }
 0x22a   :  { %13 = sbr.rel (!%p11_p4) target bundleno = 1 (0x1), region = 66 }

</bundles_post_ra>
